<compile_context>
chip_gen: v5e
topology: v5e:2x2
jax: 0.10.0
libtpu: 0.0.40
codegen_flags: <defaults>
</compile_context>

<pallas_src>
import jax
import jax.numpy as jnp
from jax.experimental import pallas as pl
from jax.experimental.pallas import tpu as pltpu


_LEAKY_SLOPE = 0.01
_U_EPS = 1e-6


def _leaky_relu(x, slope=_LEAKY_SLOPE):
    return jnp.where(x > 0, x, slope * x)


def actor_kernel(x_ref, w1_ref, b1_ref, w2_ref, b2_ref, w3_ref, b3_ref,
                 u_ref, policy_ref):
    """Fused 3-layer MLP + Gumbel-softmax policy head for one batch tile."""
    # x streams in as f32 (no extra wrapper cast / HBM pass); pack to the MXU
    # compute dtype on the VPU (which has slack) right before the first dot.
    x = x_ref[...].astype(w1_ref.dtype)

    # ---- hidden layer 1: LeakyReLU(x @ W1 + b1)  (bf16 MXU, f32 accum) ----
    h1 = jnp.dot(x, w1_ref[...], preferred_element_type=jnp.float32)
    h1 = _leaky_relu(h1 + b1_ref[...].astype(jnp.float32))

    # ---- hidden layer 2: LeakyReLU(h1 @ W2 + b2) --------------------------
    h2 = jnp.dot(h1.astype(w2_ref.dtype), w2_ref[...],
                 preferred_element_type=jnp.float32)
    h2 = _leaky_relu(h2 + b2_ref[...].astype(jnp.float32))

    # ---- output logits: h2 @ W3 + b3 --------------------------------------
    logits = jnp.dot(h2.astype(w3_ref.dtype), w3_ref[...],
                     preferred_element_type=jnp.float32)
    logits = logits + b3_ref[...].astype(jnp.float32)

    # ---- Gumbel perturbation + numerically stable softmax (f32) -----------
    # Clamp u inside the kernel so correctness does not depend on the caller.
    u = jnp.clip(u_ref[...].astype(jnp.float32), _U_EPS, 1.0 - _U_EPS)
    z = logits - jnp.log(-jnp.log(u))
    z = z - jnp.max(z, axis=-1, keepdims=True)
    e = jnp.exp(z)
    denom = jnp.sum(e, axis=-1, keepdims=True)
    # approx=True -> EUP vrcp (free slot); rows sum to 1 within ~1e-3.
    policy_ref[...] = e * pl.reciprocal(denom, approx=True)


def _round_up(n, m):
    return -(-n // m) * m


def _choose_batch_tile(batch, block_b):
    """Pick (tile, padded_batch) for the 1-D batch grid.

    * Cap the tile so the grid keeps >= 4 steps when the batch allows it
      (v7x: 2 TensorCores x >= 2 pipelined steps each; no effect on v5e/v6e).
    * Tile is a multiple of 8 (f32 sublane) unless it equals the full batch
      (block == full array dim is always legal).
    * Prefer a tile that divides the batch exactly so no pad / slice HBM
      passes are needed.
    """
    cap = max(8, min(block_b, _round_up(pl.cdiv(batch, 4), 8)))
    if batch <= cap:
        return batch, batch                    # single step, no padding
    if batch % 8 == 0:
        tb = cap - cap % 8
        while tb >= 8:
            if batch % tb == 0:
                return tb, batch               # exact tiling, no padding
            tb -= 8
    tb = cap - cap % 8
    return tb, _round_up(batch, tb)            # fall back to padding


def actor_forward(x, params, u, *, block_b=4096, compute_dtype=jnp.bfloat16):
    """Full actor forward pass in one batch-tiled Pallas kernel.

    x: (B, num_input) f32, u: (B, action_size) uniform(0,1) f32.
    Returns policy: (B, action_size) f32.
    """
    w1, b1, w2, b2, w3, b3 = params
    B, num_input = x.shape
    hidden = w1.shape[1]
    action_size = w3.shape[1]

    tb, b_padded = _choose_batch_tile(B, block_b)
    if b_padded != B:
        pad = b_padded - B
        x = jnp.pad(x, ((0, pad), (0, 0)))
        u = jnp.pad(u, ((0, pad), (0, 0)), constant_values=0.5)

    # One-time tiny weight casts for the MXU; x is cast inside the kernel.
    w1q = w1.astype(compute_dtype)
    w2q = w2.astype(compute_dtype)
    w3q = w3.astype(compute_dtype)

    const2d = lambda i: (0, 0)
    batch_map = lambda i: (i, 0)

    # Only attach an explicit VMEM limit for very aggressive tiles; the
    # default scoped limit (16/32 MiB) is ample up to ~16K-row tiles.
    est_vmem = (2 * tb * (num_input + 2 * action_size)   # double-buffered IO
                + 2 * tb * hidden) * 4                    # f32 h1/h2
    cp_kwargs = {"dimension_semantics": ("parallel",)}
    if est_vmem > 12 * 1024 * 1024:
        cp_kwargs["vmem_limit_bytes"] = min(2 * est_vmem + (8 << 20), 100 << 20)

    out = pl.pallas_call(
        actor_kernel,
        out_shape=jax.ShapeDtypeStruct((b_padded, action_size), jnp.float32),
        grid_spec=pltpu.PrefetchScalarGridSpec(
            num_scalar_prefetch=0,
            grid=(b_padded // tb,),
            in_specs=[
                pl.BlockSpec((tb, num_input), batch_map),      # x tile (f32)
                pl.BlockSpec((num_input, hidden), const2d),    # W1 (resident)
                pl.BlockSpec((1, hidden), const2d),            # b1
                pl.BlockSpec((hidden, hidden), const2d),       # W2
                pl.BlockSpec((1, hidden), const2d),            # b2
                pl.BlockSpec((hidden, action_size), const2d),  # W3
                pl.BlockSpec((1, action_size), const2d),       # b3
                pl.BlockSpec((tb, action_size), batch_map),    # u tile
            ],
            out_specs=pl.BlockSpec((tb, action_size), batch_map),
        ),
        compiler_params=pltpu.CompilerParams(**cp_kwargs),
    )(x, w1q, b1, w2q, b2, w3q, b3, u)

    return out[:B] if b_padded != B else out


def init_actor_params(key, num_input, action_size, hidden=64):
    """Xavier-uniform weights (mirrors reset_parameters), uniform biases."""
    def xavier(k, fan_in, fan_out):
        limit = jnp.sqrt(6.0 / (fan_in + fan_out))
        return jax.random.uniform(k, (fan_in, fan_out), jnp.float32,
                                  minval=-limit, maxval=limit)

    def bias(k, fan_in, fan_out):
        limit = 1.0 / jnp.sqrt(fan_in)
        return jax.random.uniform(k, (1, fan_out), jnp.float32,
                                  minval=-limit, maxval=limit)

    k1, k2, k3, k4, k5, k6 = jax.random.split(key, 6)
    w1 = xavier(k1, num_input, hidden)
    b1 = bias(k4, num_input, hidden)
    w2 = xavier(k2, hidden, hidden)
    b2 = bias(k5, hidden, hidden)
    w3 = xavier(k3, hidden, action_size)
    b3 = bias(k6, hidden, action_size)
    return (w1, b1, w2, b2, w3, b3)


def _actor_reference(x, params, u):
    """Pure-JAX f32 reference of the same forward pass (sanity check)."""
    w1, b1, w2, b2, w3, b3 = params
    h1 = _leaky_relu(x @ w1 + b1)
    h2 = _leaky_relu(h1 @ w2 + b2)
    logits = h2 @ w3 + b3
    uc = jnp.clip(u, _U_EPS, 1.0 - _U_EPS)
    return jax.nn.softmax(logits - jnp.log(-jnp.log(uc)), axis=-1)


def _check_one(batch, num_input, action_size, params, key):
    k_x, k_u = jax.random.split(key)
    x = jax.random.normal(k_x, (batch, num_input), jnp.float32)
    # Default [0,1) range is fine: the kernel clamps u internally.
    u = jax.random.uniform(k_u, (batch, action_size), jnp.float32)

    policy = actor_forward(x, params, u)
    jax.block_until_ready(policy)

    assert policy.shape == (batch, action_size)

    row_sums = jnp.sum(policy, axis=-1)
    assert bool(jnp.all(jnp.abs(row_sums - 1.0) < 5e-3))
    assert bool(jnp.all(policy >= 0.0))

    ref = _actor_reference(x, params, u)
    assert bool(jnp.all(jnp.abs(policy - ref) < 5e-2))


if __name__ == "__main__":
    num_input = 32
    action_size = 16

    root = jax.random.PRNGKey(0)
    k_param, k_a, k_b, k_c = jax.random.split(root, 4)

    params = init_actor_params(k_param, num_input, action_size)

    # TODO(synk): torch.rand_like noise is passed in as an explicit `u` input
    # (functional RNG) rather than sampled in-kernel via pltpu.prng_random_bits.
    _check_one(2, num_input, action_size, params, k_a)    # block == full batch
    _check_one(64, num_input, action_size, params, k_b)   # 4-step exact grid
    _check_one(10, num_input, action_size, params, k_c)   # padding fallback

    print("KERNEL_OK")
</pallas_src>

<mosaic_0001>
module attributes {stable_mosaic.version = 11 : i64} {
  func.func @actor_kernel(%arg0: i32, %arg1: memref<2x32xf32, #tpu.memory_space<vmem>>, %arg2: memref<32x64xbf16, #tpu.memory_space<vmem>>, %arg3: memref<1x64xf32, #tpu.memory_space<vmem>>, %arg4: memref<64x64xbf16, #tpu.memory_space<vmem>>, %arg5: memref<1x64xf32, #tpu.memory_space<vmem>>, %arg6: memref<64x16xbf16, #tpu.memory_space<vmem>>, %arg7: memref<1x16xf32, #tpu.memory_space<vmem>>, %arg8: memref<2x16xf32, #tpu.memory_space<vmem>>, %arg9: memref<2x16xf32, #tpu.memory_space<vmem>>) attributes {dimension_semantics = [#tpu.dimension_semantics<parallel>], iteration_bounds = array<i64: 1>, scalar_prefetch = 0 : i64, scratch_operands = 0 : i64, tpu.core_type = #tpu.core_type<tc>, window_params = [{transform_indices = @transform_0, window_bounds = array<i64: 2, 32>}, {pipeline_mode = #tpu.pipeline_mode<synchronous>, transform_indices = @transform_1, window_bounds = array<i64: 32, 64>}, {pipeline_mode = #tpu.pipeline_mode<synchronous>, transform_indices = @transform_2, window_bounds = array<i64: 1, 64>}, {pipeline_mode = #tpu.pipeline_mode<synchronous>, transform_indices = @transform_3, window_bounds = array<i64: 64, 64>}, {pipeline_mode = #tpu.pipeline_mode<synchronous>, transform_indices = @transform_4, window_bounds = array<i64: 1, 64>}, {pipeline_mode = #tpu.pipeline_mode<synchronous>, transform_indices = @transform_5, window_bounds = array<i64: 64, 16>}, {pipeline_mode = #tpu.pipeline_mode<synchronous>, transform_indices = @transform_6, window_bounds = array<i64: 1, 16>}, {transform_indices = @transform_7, window_bounds = array<i64: 2, 16>}, {transform_indices = @transform_8, window_bounds = array<i64: 2, 16>}]} {
    %c0 = arith.constant 0 : index
    %c0_0 = arith.constant 0 : index
    %0 = vector.load %arg1[%c0, %c0_0] : memref<2x32xf32, #tpu.memory_space<vmem>>, vector<2x32xf32>
    %1 = arith.truncf %0 : vector<2x32xf32> to vector<2x32xbf16>
    %c0_1 = arith.constant 0 : index
    %c0_2 = arith.constant 0 : index
    %2 = vector.load %arg2[%c0_1, %c0_2] : memref<32x64xbf16, #tpu.memory_space<vmem>>, vector<32x64xbf16>
    %cst = arith.constant dense<0.000000e+00> : vector<2x64xf32>
    %3 = tpu.matmul %1, %2, %cst {dimension_numbers = #tpu.dot_dimension_numbers<[1], [0], [0], [1], [0, 0, 1, 1], [], []>} : vector<2x32xbf16>, vector<32x64xbf16>, vector<2x64xf32> -> vector<2x64xf32>
    %c0_3 = arith.constant 0 : index
    %c0_4 = arith.constant 0 : index
    %4 = vector.load %arg3[%c0_3, %c0_4] : memref<1x64xf32, #tpu.memory_space<vmem>>, vector<1x64xf32>
    %5 = vector.broadcast %4 : vector<1x64xf32> to vector<2x64xf32>
    %6 = arith.addf %3, %5 : vector<2x64xf32>
    %cst_5 = arith.constant 0.000000e+00 : f32
    %7 = vector.broadcast %cst_5 : f32 to vector<2x64xf32>
    %8 = arith.cmpf ogt, %6, %7 : vector<2x64xf32>
    %cst_6 = arith.constant 0.00999999977 : f32
    %9 = vector.broadcast %cst_6 : f32 to vector<2x64xf32>
    %10 = arith.mulf %9, %6 : vector<2x64xf32>
    %11 = arith.select %8, %6, %10 : vector<2x64xi1>, vector<2x64xf32>
    %12 = arith.truncf %11 : vector<2x64xf32> to vector<2x64xbf16>
    %c0_7 = arith.constant 0 : index
    %c0_8 = arith.constant 0 : index
    %13 = vector.load %arg4[%c0_7, %c0_8] : memref<64x64xbf16, #tpu.memory_space<vmem>>, vector<64x64xbf16>
    %cst_9 = arith.constant dense<0.000000e+00> : vector<2x64xf32>
    %14 = tpu.matmul %12, %13, %cst_9 {dimension_numbers = #tpu.dot_dimension_numbers<[1], [0], [0], [1], [0, 0, 1, 1], [], []>} : vector<2x64xbf16>, vector<64x64xbf16>, vector<2x64xf32> -> vector<2x64xf32>
    %c0_10 = arith.constant 0 : index
    %c0_11 = arith.constant 0 : index
    %15 = vector.load %arg5[%c0_10, %c0_11] : memref<1x64xf32, #tpu.memory_space<vmem>>, vector<1x64xf32>
    %16 = vector.broadcast %15 : vector<1x64xf32> to vector<2x64xf32>
    %17 = arith.addf %14, %16 : vector<2x64xf32>
    %cst_12 = arith.constant 0.000000e+00 : f32
    %18 = vector.broadcast %cst_12 : f32 to vector<2x64xf32>
    %19 = arith.cmpf ogt, %17, %18 : vector<2x64xf32>
    %cst_13 = arith.constant 0.00999999977 : f32
    %20 = vector.broadcast %cst_13 : f32 to vector<2x64xf32>
    %21 = arith.mulf %20, %17 : vector<2x64xf32>
    %22 = arith.select %19, %17, %21 : vector<2x64xi1>, vector<2x64xf32>
    %23 = arith.truncf %22 : vector<2x64xf32> to vector<2x64xbf16>
    %c0_14 = arith.constant 0 : index
    %c0_15 = arith.constant 0 : index
    %24 = vector.load %arg6[%c0_14, %c0_15] : memref<64x16xbf16, #tpu.memory_space<vmem>>, vector<64x16xbf16>
    %cst_16 = arith.constant dense<0.000000e+00> : vector<2x16xf32>
    %25 = tpu.matmul %23, %24, %cst_16 {dimension_numbers = #tpu.dot_dimension_numbers<[1], [0], [0], [1], [0, 0, 1, 1], [], []>} : vector<2x64xbf16>, vector<64x16xbf16>, vector<2x16xf32> -> vector<2x16xf32>
    %c0_17 = arith.constant 0 : index
    %c0_18 = arith.constant 0 : index
    %26 = vector.load %arg7[%c0_17, %c0_18] : memref<1x16xf32, #tpu.memory_space<vmem>>, vector<1x16xf32>
    %27 = vector.broadcast %26 : vector<1x16xf32> to vector<2x16xf32>
    %28 = arith.addf %25, %27 : vector<2x16xf32>
    %c0_19 = arith.constant 0 : index
    %c0_20 = arith.constant 0 : index
    %29 = vector.load %arg8[%c0_19, %c0_20] : memref<2x16xf32, #tpu.memory_space<vmem>>, vector<2x16xf32>
    %cst_21 = arith.constant 9.99999997E-7 : f32
    %cst_22 = arith.constant 0.999998986 : f32
    %30 = vector.broadcast %cst_21 : f32 to vector<2x16xf32>
    %31 = arith.maximumf %30, %29 : vector<2x16xf32>
    %32 = vector.broadcast %cst_22 : f32 to vector<2x16xf32>
    %33 = arith.minimumf %32, %31 : vector<2x16xf32>
    %34 = math.log %33 : vector<2x16xf32>
    %cst_23 = arith.constant 0.000000e+00 : f32
    %35 = vector.broadcast %cst_23 : f32 to vector<2x16xf32>
    %36 = arith.subf %35, %34 : vector<2x16xf32>
    %37 = math.log %36 : vector<2x16xf32>
    %38 = arith.subf %28, %37 : vector<2x16xf32>
    %cst_24 = arith.constant dense<0xFF800000> : vector<2xf32>
    %39 = vector.multi_reduction <maximumf>, %38, %cst_24 [1] : vector<2x16xf32> to vector<2xf32>
    %40 = vector.shape_cast %39 : vector<2xf32> to vector<2x1xf32>
    %41 = vector.broadcast %40 : vector<2x1xf32> to vector<2x16xf32>
    %42 = arith.subf %38, %41 : vector<2x16xf32>
    %43 = math.exp %42 : vector<2x16xf32>
    %cst_25 = arith.constant dense<0.000000e+00> : vector<2xf32>
    %44 = vector.multi_reduction <add>, %43, %cst_25 [1] : vector<2x16xf32> to vector<2xf32>
    %45 = vector.shape_cast %44 : vector<2xf32> to vector<2x1xf32>
    %46 = tpu.reciprocal %45 {approx = true} : vector<2x1xf32> -> vector<2x1xf32>
    %47 = vector.broadcast %46 : vector<2x1xf32> to vector<2x16xf32>
    %48 = arith.mulf %43, %47 : vector<2x16xf32>
    %c0_26 = arith.constant 0 : index
    %c0_27 = arith.constant 0 : index
    %49 = vector.load %arg9[%c0_26, %c0_27] : memref<2x16xf32, #tpu.memory_space<vmem>>, vector<2x16xf32>
    tpu.vector_store %arg9[%c0_26, %c0_27], %48 {strides = array<i32>} : memref<2x16xf32, #tpu.memory_space<vmem>>, vector<2x16xf32>,
    return
  }
  func.func @transform_0(%arg0: i32) -> (i32, i32) {
    %c0_i32 = arith.constant 0 : i32
    %c0_i32_0 = arith.constant 0 : i32
    return %arg0, %c0_i32 : i32, i32
  }
  func.func @transform_1(%arg0: i32) -> (i32, i32) {
    %c0_i32 = arith.constant 0 : i32
    %c0_i32_0 = arith.constant 0 : i32
    %c0_i32_1 = arith.constant 0 : i32
    return %c0_i32, %c0_i32_0 : i32, i32
  }
  func.func @transform_2(%arg0: i32) -> (i32, i32) {
    %c0_i32 = arith.constant 0 : i32
    %c0_i32_0 = arith.constant 0 : i32
    %c0_i32_1 = arith.constant 0 : i32
    return %c0_i32, %c0_i32_0 : i32, i32
  }
  func.func @transform_3(%arg0: i32) -> (i32, i32) {
    %c0_i32 = arith.constant 0 : i32
    %c0_i32_0 = arith.constant 0 : i32
    %c0_i32_1 = arith.constant 0 : i32
    return %c0_i32, %c0_i32_0 : i32, i32
  }
  func.func @transform_4(%arg0: i32) -> (i32, i32) {
    %c0_i32 = arith.constant 0 : i32
    %c0_i32_0 = arith.constant 0 : i32
    %c0_i32_1 = arith.constant 0 : i32
    return %c0_i32, %c0_i32_0 : i32, i32
  }
  func.func @transform_5(%arg0: i32) -> (i32, i32) {
    %c0_i32 = arith.constant 0 : i32
    %c0_i32_0 = arith.constant 0 : i32
    %c0_i32_1 = arith.constant 0 : i32
    return %c0_i32, %c0_i32_0 : i32, i32
  }
  func.func @transform_6(%arg0: i32) -> (i32, i32) {
    %c0_i32 = arith.constant 0 : i32
    %c0_i32_0 = arith.constant 0 : i32
    %c0_i32_1 = arith.constant 0 : i32
    return %c0_i32, %c0_i32_0 : i32, i32
  }
  func.func @transform_7(%arg0: i32) -> (i32, i32) {
    %c0_i32 = arith.constant 0 : i32
    %c0_i32_0 = arith.constant 0 : i32
    return %arg0, %c0_i32 : i32, i32
  }
  func.func @transform_8(%arg0: i32) -> (i32, i32) {
    %c0_i32 = arith.constant 0 : i32
    %c0_i32_0 = arith.constant 0 : i32
    return %arg0, %c0_i32 : i32, i32
  }
}

</mosaic_0001>

<bundles_post_ra>
// kernel: tpu_custom_call.1
= control target key start
LH: loop header
LB: loop body
LE: loop exit
PB: predicated region body
PF: predicated region fallthrough
CT: control target
= control target key end

     0   :  { %13 = vsyncpa [#allocation3], 0  ;;  %s457_s0 = inlined_call_operand.vmem [shape: f32[2,32], index: 0, kind: input, shape index: {}]   ;;  %s458_s1 = inlined_call_operand.hbm [shape: bf16[32,64], index: 1, kind: input, shape index: {}]   ;;  %s459_s2 = inlined_call_operand.vmem [shape: f32[1,64], index: 2, kind: input, shape index: {}]   ;;  %s460_s3 = inlined_call_operand.vmem [shape: bf16[64,64], index: 3, kind: input, shape index: {}]   ;;  %s461_s4 = inlined_call_operand.vmem [shape: f32[1,64], index: 4, kind: input, shape index: {}]   ;;  %s462_s5 = inlined_call_operand.vmem [shape: bf16[64,16], index: 5, kind: input, shape index: {}]   ;;  %s463_s6 = inlined_call_operand.vmem [shape: f32[1,16], index: 6, kind: input, shape index: {}]   ;;  %s464_s7 = inlined_call_operand.vmem [shape: f32[2,16], index: 7, kind: input, shape index: {}]   ;;  %s465_s8 = inlined_call_operand.hbm [shape: f32[2,16], index: 8, kind: output, shape index: {}]  }
   0x1   :  { %14 = vsyncpa [#allocation4], 0  ;;  %s21_s29 = sshll.u32 %s458_s1, 4  ;;  %s358_s30 = smov [#allocation2]   ;;  %s22_s29 = int_to_ptr.hbm [resolvable:$true] %s21_s29 }
   0x2   :  { %s23_s9 = sshll.u32 %s358_s30, 4  ;;  %s359_s10 = smov 64   ;;  %s24_s9 = int_to_ptr.vmem [resolvable:$true] %s23_s9 }
   0x3   :  { %s360_s11 = smov 4  }
   0x4   :  { %29 = dma.hbm_to_vmem [thread:$0]  %s22_s29, 256, %s24_s9, [#allocation3], %s359_s10, %s359_s10, %s360_s11  }
   0x5   :  { %354 = dma.done.wait [#allocation3], 256  }
   0x6   :  { %355 = vsyncadd [#allocation3], 4294967040  ;;  %v282_v0 = vld [vmem:[#allocation2 + $0x8] sm:$0xff]  ;;  %v281_v1 = vld [vmem:[#allocation2] sm:$0xff]  ;;  %vm69_vm0 = vcmask 261120   ;;  %vm126_vm2 = vcmask 523264  }
   0x7   :  { %v286_v2 = vld [vmem:[%s460_s3 + $0x18] sm:$0xff]  ;;  %79 = vmatpush.bf16.msra.mxu0 %v282_v0  ;;  %v47_v3 = vld [vmem:[%s457_s0] sm:$0x3]  ;;  %v285_v4 = vld [vmem:[%s460_s3 + $0x10] sm:$0xff]  ;;  %vm208_vm4 = vcmask 123904   ;;  %s228_s12 = sshll.u32 %s465_s8, 4  ;;  %s229_s12 = int_to_ptr.hbm [resolvable:$true] %s228_s12 }
   0x8   :  { %134 = vmatpush.bf16.msra.mxu1 %v286_v2  ;;  %v48_v5 = vpack.c.bf16 %v47_v3, %v47_v3  ;;  %v284_v6 = vld [vmem:[%s460_s3 + $0x8] sm:$0xff]  ;;  %v283_v7 = vld [vmem:[%s460_s3] sm:$0xff]  ;;  %v290_v8 = vld [vmem:[%s462_s5 + $0x18] sm:$0xff] }
   0x9   :  { %190 = vmatpush.bf16.msra.mxu2 %v290_v8  ;;  %v289_v9 = vld [vmem:[%s462_s5 + $0x10] sm:$0xff]  ;;  %v295_v10 = vld [vmem:[%s459_s2] ss:$0 sm:$0xff]  ;;  %v288_v17 = vld [vmem:[%s462_s5 + $0x8] sm:$0xff] }
   0xa   :  { %v287_v18 = vld [vmem:[%s462_s5] sm:$0xff] }
   0xb   :  { %80 = vmatpush.bf16.msra.mxu0 %v281_v1  ;;  %v296_v19 = vld [vmem:[%s461_s4] ss:$0 sm:$0xff] }
   0xc   :  { %135 = vmatpush.bf16.msra.mxu1 %v285_v4  ;;  %v199_v26 = vld [vmem:[%s464_s7] sm:$0x3] }
   0xd   :  { %191 = vmatpush.bf16.msra.mxu2 %v289_v9  ;;  %v200_v27 = vmax.f32 %v199_v26, 1e-06  ;;  %v297_v33 = vld [vmem:[%s463_s6] ss:$0 sm:$0xff]  ;;  %s361_s6 = smov [#allocation5]  }
   0xe   :  { %246 = vmatmul.msk.bf16.vlgmr.msra.gmra.mxu0 %vm69_vm0, %v48_v5  ;;  %s226_s7 = sshll.u32 %s361_s6, 4  ;;  %s227_s7 = int_to_ptr.vmem [resolvable:$true] %s226_s7 }
   0xf   :  { %v201_v28 = vmin.f32 %v200_v27, 0.999999 }
  0x10   :  { %136 = vmatpush.bf16.msra.mxu1 %v284_v6 }
  0x11   :  { %192 = vmatpush.bf16.msra.mxu2 %v288_v17  ;;  %298 = vlog2.f32 %v201_v28 }
  0x14   :  { %137 = vmatpush.bf16.msra.mxu1 %v283_v7 }
  0x15   :  { %193 = vmatpush.bf16.msra.mxu2 %v287_v18 }
  0x17   :  { %v299_v29 = vpop.eup %298 }
  0x18   :  { %v203_v30 = vmul.f32 0.6931472, %v299_v29 }
  0x1a   :  { %v204_v31 = vsub.f32 0.0, %v203_v30 }
  0x1c   :  { %300 = vlog2.f32 %v204_v31 }
  0x22   :  { %v301_v32 = vpop.eup %300 }
  0x23   :  { %v206_v34 = vmul.f32 0.6931472, %v301_v32 }
  0x8b   :  { %v82_v11 = vpop.f32.mrf.mxu0 }
  0x8c   :  { %v83_v12 = vadd.f32 %v295_v10, %v82_v11 }
  0x8e   :  { %vm86_vm1 = vcmp.gt.f32.partialorder %v83_v12, 0.0  ;;  %v87_v13 = vmul.f32 0.01, %v83_v12 }
  0x90   :  { %v88_v14 = vsel %vm86_vm1, %v83_v12, %v87_v13 }
  0x91   :  { %v89_v15 = vpack.c.bf16 %v88_v14, %v88_v14 }
  0x93   :  { %v84_v16 = vpop.f32.mrf.mxu0  ;;  %263 = vmatmul.msk.bf16.vlgmr.msra.gmra.mxu1 %vm126_vm2, %v89_v15 }
 0x110   :  { %v139_v20 = vpop.f32.mrf.mxu1 }
 0x111   :  { %v140_v21 = vadd.f32 %v296_v19, %v139_v20 }
 0x113   :  { %vm143_vm3 = vcmp.gt.f32.partialorder %v140_v21, 0.0  ;;  %v144_v22 = vmul.f32 0.01, %v140_v21 }
 0x115   :  { %v145_v23 = vsel %vm143_vm3, %v140_v21, %v144_v22 }
 0x116   :  { %v146_v24 = vpack.c.bf16 %v145_v23, %v145_v23 }
 0x118   :  { %v141_v25 = vpop.f32.mrf.mxu1  ;;  %280 = vmatmul.msk.bf16.vlgmr.msra.gmra.mxu2 %vm126_vm2, %v146_v24 }
 0x19b   :  { %v195_v35 = vpop.f32.mrf.mxu2 }
 0x19c   :  { %v196_v36 = vadd.f32 %v297_v33, %v195_v35 }
 0x19e   :  { %v207_v37 = vsub.f32 %v196_v36, %v206_v34 }
 0x1a0   :  { %v209_v38 = vsel %vm208_vm4, %v207_v37, -inf }
 0x1a1   :  { %210 = vmax.xlane.f32.xlu0 %v209_v38 }
 0x1a3   :  { %v197_v39 = vpop.f32.mrf.mxu2 }
 0x214   :  { %v211_v40 = vpop.xlane.xlu0 %210 }
 0x215   :  { %v212_v41 = vsub.f32 %v207_v37, %v211_v40 }
 0x217   :  { %v213_v42 = vmul.f32 1.442695, %v212_v41 }
 0x219   :  { %302 = vpow2.f32 %v213_v42 }
 0x21f   :  { %v303_v43 = vpop.eup %302 }
 0x220   :  { %v215_v44 = vsel %vm208_vm4, %v303_v43, 0.0 }
 0x221   :  { %216 = vadd.xlane.f32.xlu0 %v215_v44 }
 0x294   :  { %v217_v45 = vpop.xlane.xlu0 %216 }
 0x295   :  { %304 = vrcp.f32 %v217_v45 }
 0x29b   :  { %v305_v46 = vpop.eup %304 }
 0x29c   :  { %v219_v47 = vmul.f32 %v305_v46, %v303_v43 }
 0x29e   :  { %220 = vst.msk [vmem:[#allocation5] sm:$0x3] %vm208_vm4, %v219_v47 }
 0x29f   :  { %231 = dma.vmem_to_hbm [thread:$0]  %s227_s7, 32, %s229_s12, [#allocation4]  }
 0x2a0   :  { %356 = dma.done.wait [#allocation4], 32  }
 0x2a1   :  { %357 = vsyncadd [#allocation4], 4294967264 }
 0x2a2   :  { %236 = vsyncpa [#allocation3], 1 }
 0x2a3   :  { %237 = vsyncpa [#allocation4], 1 }

</bundles_post_ra>
